<compile_context>
chip_gen: v6e
topology: v6e:2x2x1
jax: 0.10.0
libtpu: 0.0.40
codegen_flags: <defaults>
</compile_context>

<pallas_src>
import math

import jax
import jax.numpy as jnp
from jax.experimental import pallas as pl
from jax.experimental.pallas import tpu as pltpu


def _attention_tunable_kernel(q_ref, kt_ref, v_ref, wqk_ref, wv_ref, o_ref):
    # Block shapes:
    #   q_ref : (G, n_q, d_k)      kt_ref: (G, d_k, n_k)   (K pre-transposed)
    #   v_ref : (G, n_k, d_v)
    #   wqk_ref: (d_k, d_k)        wv_ref: (d_v, d_model)   (resident in VMEM)
    #   o_ref : (1, n_q, G * d_model)   -- heads packed along the lane dim
    G, n_q, d_k = q_ref.shape
    _, n_k, d_v = v_ref.shape
    d_model = wv_ref.shape[1]
    mm_dtype = q_ref.dtype              # matmul input dtype (f32 or bf16)

    wqk = wqk_ref[...]
    wv = wv_ref[...]

    # Head-batched projections as plain 2-D MXU matmuls (reshape merges the
    # leading sublane-tiled dims only; lane dim untouched -> free).
    qw = jnp.dot(q_ref[...].reshape(G * n_q, d_k), wqk,
                 preferred_element_type=jnp.float32).reshape(G, n_q, d_k)
    vp = jnp.dot(v_ref[...].reshape(G * n_k, d_v), wv,
                 preferred_element_type=jnp.float32).reshape(G, n_k, d_model)

    # Per-head logits in native NN form (contraction dim is already laid out as
    # the leading non-batch dim of kt_ref -> no in-kernel transpose of K).
    s = jnp.einsum("gqd,gdk->gqk", qw.astype(mm_dtype), kt_ref[...],
                   preferred_element_type=jnp.float32)          # (G, n_q, n_k)

    # softmax over the *query* axis (== torch.softmax(x, dim=0, dtype=float)).
    # Exact normalization (f32) — fixes the 1e-3 mismatch from approx recip.
    m = jnp.max(s, axis=1, keepdims=True)
    e = jnp.exp(s - m)
    p = e / jnp.sum(e, axis=1, keepdims=True)

    # Per-head PV matmuls, then one relayout into the lane-packed output block.
    o = jnp.einsum("gqk,gkm->gqm", p.astype(mm_dtype), vp.astype(mm_dtype),
                   preferred_element_type=jnp.float32)          # (G, n_q, d_model)
    o_ref[0] = (jnp.swapaxes(o, 0, 1)                           # (n_q, G, d_model)
                   .reshape(n_q, G * d_model)
                   .astype(o_ref.dtype))


def _choose_heads_per_block(H, n_q, n_k, d_k, d_v, d_model, in_itemsize):
    """Pick G (heads per grid step) and estimate the VMEM working set (bytes)."""
    g0 = 128 // math.gcd(128, d_model)       # min G for a 128-lane-dense output
    # Per-head bytes: double-buffered Q/K/V input blocks + double-buffered
    # f32 output slice.
    per_head = (2 * (n_q * d_k + d_k * n_k + n_k * d_v) * in_itemsize
                + 2 * n_q * d_model * 4)
    weight_bytes = (d_k * d_k + d_v * d_model) * in_itemsize

    if H % g0 != 0:
        # Correct fallback (masked stores on a <128-lane output block).
        # TODO(synk): pad H up to a multiple of g0 to keep lane-dense stores.
        return 1, per_head + weight_bytes

    budget = 12 * 1024 * 1024   # headroom under v5e's 16 MiB scoped-VMEM default
    cands = [g for g in range(g0, H + 1, g0)
             if H % g == 0 and g * per_head + weight_bytes <= budget]
    if not cands:
        return g0, g0 * per_head + weight_bytes
    # Prefer >= 2 grid steps so v7x's two TensorCores both get work.
    multi = [g for g in cands if H // g >= 2]
    g = max(multi) if multi else max(cands)
    return g, g * per_head + weight_bytes


def attention_tunable(Q, K, V, w_q, w_k, w_v, *, matmul_dtype=jnp.float32):
    """softmax(Q @ w_q @ (K @ w_k).T, dim=0, float32) @ (V @ w_v).

    Q, K, V may be a single instance (2-D) or a stack of H independent
    instances sharing the weights (3-D, leading head axis).  `matmul_dtype`
    controls the MXU input dtype (bf16 recommended on v6e/v7x); accumulation
    and all softmax math stay float32.
    """
    squeeze = Q.ndim == 2
    if squeeze:
        Q, K, V = Q[None], K[None], V[None]

    H, n_q, d_k = Q.shape
    _, n_k, d_v = V.shape
    d_model = w_v.shape[1]

    # Algebraic fold (one tiny matmul in f32, amortized over all heads):
    #   (Q w_q)(K w_k)^T == Q (w_q w_k^T) K^T
    W_qk = jnp.dot(w_q, w_k.T)                              # (d_k, d_k)

    itemsize = jnp.dtype(matmul_dtype).itemsize
    G, est_vmem = _choose_heads_per_block(H, n_q, n_k, d_k, d_v, d_model, itemsize)
    grid = (H // G,)

    # Pre-transpose K so the in-kernel logits contraction is native NN form.
    Kt = jnp.swapaxes(K, 1, 2)                              # (H, d_k, n_k)

    Qc = Q.astype(matmul_dtype)
    Ktc = Kt.astype(matmul_dtype)
    Vc = V.astype(matmul_dtype)
    Wqkc = W_qk.astype(matmul_dtype)
    wvc = w_v.astype(matmul_dtype)

    params = {"dimension_semantics": ("parallel",)}         # shard heads across TCs
    if est_vmem > 12 * 1024 * 1024:
        # Only needed when blocks grow past the v5e 16 MiB scoped-VMEM default.
        params["vmem_limit_bytes"] = int(min(2 * est_vmem, 48 * 1024 * 1024))

    out_packed = pl.pallas_call(
        _attention_tunable_kernel,
        out_shape=jax.ShapeDtypeStruct((H // G, n_q, G * d_model), jnp.float32),
        grid=grid,
        in_specs=[
            pl.BlockSpec((G, n_q, d_k), lambda g: (g, 0, 0)),
            pl.BlockSpec((G, d_k, n_k), lambda g: (g, 0, 0)),
            pl.BlockSpec((G, n_k, d_v), lambda g: (g, 0, 0)),
            pl.BlockSpec((d_k, d_k), lambda g: (0, 0)),        # resident weight
            pl.BlockSpec((d_v, d_model), lambda g: (0, 0)),    # resident weight
        ],
        out_specs=pl.BlockSpec((1, n_q, G * d_model), lambda g: (g, 0, 0)),
        compiler_params=pltpu.CompilerParams(**params),
    )(Qc, Ktc, Vc, Wqkc, wvc)

    # Unpack lane-packed heads back to (H, n_q, d_model) — layout plumbing only.
    out = (out_packed.reshape(H // G, n_q, G, d_model)
                     .transpose(0, 2, 1, 3)
                     .reshape(H, n_q, d_model))
    return out[0] if squeeze else out


def _reference(Q, K, V, w_q, w_k, w_v):
    s = ((Q @ w_q) @ (K @ w_k).T).astype(jnp.float32)
    return jax.nn.softmax(s, axis=0) @ (V @ w_v)


if __name__ == "__main__":
    # Small, module-consistent shapes.
    d_k, d_v, d_model = 32, 16, 32
    n_q, n_k = 8, 8
    H = 16   # independent attention instances sharing the weights

    key = jax.random.PRNGKey(0)
    kq, kk, kv, kwq, kwk, kwv = jax.random.split(key, 6)

    Qb = jax.random.normal(kq, (H, n_q, d_k), dtype=jnp.float32)
    Kb = jax.random.normal(kk, (H, n_k, d_k), dtype=jnp.float32)
    Vb = jax.random.normal(kv, (H, n_k, d_v), dtype=jnp.float32)

    # Deterministic parameter init (torch.empty is uninitialized; use normals).
    w_q = jax.random.normal(kwq, (d_k, d_model), dtype=jnp.float32) * 0.1
    w_k = jax.random.normal(kwk, (d_k, d_model), dtype=jnp.float32) * 0.1
    w_v = jax.random.normal(kwv, (d_v, d_model), dtype=jnp.float32) * 0.1

    ref_b = jax.vmap(_reference, in_axes=(0, 0, 0, None, None, None))(
        Qb, Kb, Vb, w_q, w_k, w_v)

    # Batched f32 path (exact normalization): tight tolerance.
    out_b = jax.block_until_ready(attention_tunable(Qb, Kb, Vb, w_q, w_k, w_v))
    assert out_b.shape == (H, n_q, d_model)
    assert out_b.dtype == jnp.float32
    assert jnp.allclose(out_b, ref_b, atol=1e-3, rtol=1e-3)

    # bf16 MXU-input path (v6e/v7x fast path): bf16-level tolerance.
    out_bf = jax.block_until_ready(
        attention_tunable(Qb, Kb, Vb, w_q, w_k, w_v, matmul_dtype=jnp.bfloat16))
    assert out_bf.shape == (H, n_q, d_model)
    assert out_bf.dtype == jnp.float32
    assert jnp.allclose(out_bf, ref_b, atol=2e-2, rtol=2e-2)

    # Single-instance path (exact module signature).
    out_1 = jax.block_until_ready(
        attention_tunable(Qb[0], Kb[0], Vb[0], w_q, w_k, w_v))
    ref_1 = _reference(Qb[0], Kb[0], Vb[0], w_q, w_k, w_v)
    assert out_1.shape == (n_q, d_model)
    assert out_1.dtype == jnp.float32
    assert jnp.allclose(out_1, ref_1, atol=1e-3, rtol=1e-3)

    print("KERNEL_OK")
</pallas_src>

<mosaic_0001>
module attributes {stable_mosaic.version = 11 : i64} {
  func.func @_attention_tunable_kernel(%arg0: i32, %arg1: memref<8x8x32xf32, #tpu.memory_space<vmem>>, %arg2: memref<8x32x8xf32, #tpu.memory_space<vmem>>, %arg3: memref<8x8x16xf32, #tpu.memory_space<vmem>>, %arg4: memref<32x32xf32, #tpu.memory_space<vmem>>, %arg5: memref<16x32xf32, #tpu.memory_space<vmem>>, %arg6: memref<1x8x256xf32, #tpu.memory_space<vmem>>) attributes {dimension_semantics = [#tpu.dimension_semantics<parallel>], iteration_bounds = array<i64: 2>, scalar_prefetch = 0 : i64, scratch_operands = 0 : i64, tpu.core_type = #tpu.core_type<tc>, window_params = [{transform_indices = @transform_0, window_bounds = array<i64: 8, 8, 32>}, {transform_indices = @transform_1, window_bounds = array<i64: 8, 32, 8>}, {transform_indices = @transform_2, window_bounds = array<i64: 8, 8, 16>}, {pipeline_mode = #tpu.pipeline_mode<synchronous>, transform_indices = @transform_3, window_bounds = array<i64: 32, 32>}, {pipeline_mode = #tpu.pipeline_mode<synchronous>, transform_indices = @transform_4, window_bounds = array<i64: 16, 32>}, {transform_indices = @transform_5, window_bounds = array<i64: 1, 8, 256>}]} {
    %c0 = arith.constant 0 : index
    %c0_0 = arith.constant 0 : index
    %0 = vector.load %arg4[%c0, %c0_0] : memref<32x32xf32, #tpu.memory_space<vmem>>, vector<32x32xf32>
    %c0_1 = arith.constant 0 : index
    %c0_2 = arith.constant 0 : index
    %1 = vector.load %arg5[%c0_1, %c0_2] : memref<16x32xf32, #tpu.memory_space<vmem>>, vector<16x32xf32>
    %c0_3 = arith.constant 0 : index
    %c0_4 = arith.constant 0 : index
    %c0_5 = arith.constant 0 : index
    %2 = vector.load %arg1[%c0_3, %c0_4, %c0_5] : memref<8x8x32xf32, #tpu.memory_space<vmem>>, vector<8x8x32xf32>
    %3 = vector.shape_cast %2 : vector<8x8x32xf32> to vector<64x32xf32>
    %cst = arith.constant dense<0.000000e+00> : vector<64x32xf32>
    %4 = tpu.matmul %3, %0, %cst {dimension_numbers = #tpu.dot_dimension_numbers<[1], [0], [0], [1], [0, 0, 1, 1], [], []>} : vector<64x32xf32>, vector<32x32xf32>, vector<64x32xf32> -> vector<64x32xf32>
    %5 = vector.shape_cast %4 : vector<64x32xf32> to vector<8x8x32xf32>
    %c0_6 = arith.constant 0 : index
    %c0_7 = arith.constant 0 : index
    %c0_8 = arith.constant 0 : index
    %6 = vector.load %arg3[%c0_6, %c0_7, %c0_8] : memref<8x8x16xf32, #tpu.memory_space<vmem>>, vector<8x8x16xf32>
    %7 = vector.shape_cast %6 : vector<8x8x16xf32> to vector<64x16xf32>
    %cst_9 = arith.constant dense<0.000000e+00> : vector<64x32xf32>
    %8 = tpu.matmul %7, %1, %cst_9 {dimension_numbers = #tpu.dot_dimension_numbers<[1], [0], [0], [1], [0, 0, 1, 1], [], []>} : vector<64x16xf32>, vector<16x32xf32>, vector<64x32xf32> -> vector<64x32xf32>
    %9 = vector.shape_cast %8 : vector<64x32xf32> to vector<8x8x32xf32>
    %c0_10 = arith.constant 0 : index
    %c0_11 = arith.constant 0 : index
    %c0_12 = arith.constant 0 : index
    %10 = vector.load %arg2[%c0_10, %c0_11, %c0_12] : memref<8x32x8xf32, #tpu.memory_space<vmem>>, vector<8x32x8xf32>
    "tpu.trace_start"() <{level = 10 : i32, message = "gqd,gdk->gqk"}> : () -> ()
    %cst_13 = arith.constant dense<0.000000e+00> : vector<8x8x8xf32>
    %11 = tpu.matmul %5, %10, %cst_13 {dimension_numbers = #tpu.dot_dimension_numbers<[2], [1], [1], [2], [0, 0, 0, 1, 1, 2], [0], [0]>} : vector<8x8x32xf32>, vector<8x32x8xf32>, vector<8x8x8xf32> -> vector<8x8x8xf32>
    "tpu.trace_stop"() : () -> ()
    %cst_14 = arith.constant dense<0xFF800000> : vector<8x8xf32>
    %12 = vector.multi_reduction <maximumf>, %11, %cst_14 [1] : vector<8x8x8xf32> to vector<8x8xf32>
    %13 = vector.shape_cast %12 : vector<8x8xf32> to vector<8x1x8xf32>
    %14 = vector.broadcast %13 : vector<8x1x8xf32> to vector<8x8x8xf32>
    %15 = arith.subf %11, %14 : vector<8x8x8xf32>
    %16 = math.exp %15 : vector<8x8x8xf32>
    %cst_15 = arith.constant dense<0.000000e+00> : vector<8x8xf32>
    %17 = vector.multi_reduction <add>, %16, %cst_15 [1] : vector<8x8x8xf32> to vector<8x8xf32>
    %18 = vector.shape_cast %17 : vector<8x8xf32> to vector<8x1x8xf32>
    %19 = vector.broadcast %18 : vector<8x1x8xf32> to vector<8x8x8xf32>
    %20 = arith.divf %16, %19 : vector<8x8x8xf32>
    "tpu.trace_start"() <{level = 10 : i32, message = "gqk,gkm->gqm"}> : () -> ()
    %cst_16 = arith.constant dense<0.000000e+00> : vector<8x8x32xf32>
    %21 = tpu.matmul %20, %9, %cst_16 {dimension_numbers = #tpu.dot_dimension_numbers<[2], [1], [1], [2], [0, 0, 0, 1, 1, 2], [0], [0]>} : vector<8x8x8xf32>, vector<8x8x32xf32>, vector<8x8x32xf32> -> vector<8x8x32xf32>
    "tpu.trace_stop"() : () -> ()
    %22 = tpu.transpose %21, [1, 0, 2] : vector<8x8x32xf32> -> vector<8x8x32xf32>
    %23 = vector.shape_cast %22 : vector<8x8x32xf32> to vector<8x256xf32>
    %c0_17 = arith.constant 0 : index
    %c0_18 = arith.constant 0 : index
    %c0_19 = arith.constant 0 : index
    %24 = vector.load %arg6[%c0_17, %c0_18, %c0_19] : memref<1x8x256xf32, #tpu.memory_space<vmem>>, vector<1x8x256xf32>
    %25 = vector.shape_cast %24 : vector<1x8x256xf32> to vector<8x256xf32>
    %26 = vector.shape_cast %23 : vector<8x256xf32> to vector<1x8x256xf32>
    tpu.vector_store %arg6[%c0_17, %c0_18, %c0_19], %26 {strides = array<i32>} : memref<1x8x256xf32, #tpu.memory_space<vmem>>, vector<1x8x256xf32>,
    return
  }
  func.func @transform_0(%arg0: i32) -> (i32, i32, i32) {
    %c0_i32 = arith.constant 0 : i32
    %c0_i32_0 = arith.constant 0 : i32
    %c0_i32_1 = arith.constant 0 : i32
    return %arg0, %c0_i32, %c0_i32_0 : i32, i32, i32
  }
  func.func @transform_1(%arg0: i32) -> (i32, i32, i32) {
    %c0_i32 = arith.constant 0 : i32
    %c0_i32_0 = arith.constant 0 : i32
    %c0_i32_1 = arith.constant 0 : i32
    return %arg0, %c0_i32, %c0_i32_0 : i32, i32, i32
  }
  func.func @transform_2(%arg0: i32) -> (i32, i32, i32) {
    %c0_i32 = arith.constant 0 : i32
    %c0_i32_0 = arith.constant 0 : i32
    %c0_i32_1 = arith.constant 0 : i32
    return %arg0, %c0_i32, %c0_i32_0 : i32, i32, i32
  }
  func.func @transform_3(%arg0: i32) -> (i32, i32) {
    %c0_i32 = arith.constant 0 : i32
    %c0_i32_0 = arith.constant 0 : i32
    %c0_i32_1 = arith.constant 0 : i32
    return %c0_i32, %c0_i32_0 : i32, i32
  }
  func.func @transform_4(%arg0: i32) -> (i32, i32) {
    %c0_i32 = arith.constant 0 : i32
    %c0_i32_0 = arith.constant 0 : i32
    %c0_i32_1 = arith.constant 0 : i32
    return %c0_i32, %c0_i32_0 : i32, i32
  }
  func.func @transform_5(%arg0: i32) -> (i32, i32, i32) {
    %c0_i32 = arith.constant 0 : i32
    %c0_i32_0 = arith.constant 0 : i32
    %c0_i32_1 = arith.constant 0 : i32
    return %arg0, %c0_i32, %c0_i32_0 : i32, i32, i32
  }
}

</mosaic_0001>

<bundles_post_ra>
// kernel: tpu_custom_call.1
= control target key start
LH: loop header
LB: loop body
LE: loop exit
PB: predicated region body
PF: predicated region fallthrough
CT: control target
= control target key end

     0   :  { %10 = vsyncpa [#allocation3], 0  ;;  %s3174_s0 = inlined_call_operand.vmem [shape: f32[16,8,32], index: 0, kind: input, shape index: {}]   ;;  %s3175_s1 = inlined_call_operand.vmem [shape: f32[16,32,8], index: 1, kind: input, shape index: {}]   ;;  %s3176_s2 = inlined_call_operand.vmem [shape: f32[16,8,16], index: 2, kind: input, shape index: {}]   ;;  %s3177_s3 = inlined_call_operand.vmem [shape: f32[32,32], index: 3, kind: input, shape index: {}]   ;;  %s3178_s4 = inlined_call_operand.vmem [shape: f32[16,32], index: 4, kind: input, shape index: {}]   ;;  %s3179_s5 = inlined_call_operand.hbm [shape: f32[2,8,256], index: 5, kind: output, shape index: {}]  }
   0x1   :  { %12 = vsyncpa [#allocation3 + $0x1], 0  ;;  %s2790_s18 = smov 0   ;;  %s2792_s19 = smov 0  }
   0x2   :  { %s2794_s20 = smov 0   ;;  %s2796_s21 = smov 0  }
   0x3 LB: > { %s2811_s22 = sadd.s32 4294967295, %s2750_s21   ;;  %s2311_s23 = sadd.s32 4294967294, %s2750_s21   ;;  %s2750_s21 = sphi %s2796_s21, %s3185_s21   ;;  %s2746_s20 = sphi %s2794_s20, %s3184_s20   ;;  %s2742_s19 = sphi %s2792_s19, %s3183_s19   ;;  %s2738_s18 = sphi %s2790_s18, %s3182_s18  }
   0x4   : > { %s2815_s24 = sadd.s32 1, %s2750_s21   ;;  %s145_s25 = sadd.s32 1, %s2746_s20 }
   0x5   : > { %s142_s26 = ssub.s32 %s2750_s21, %s2815_s24  ;;  %p155_p0 = scmp.ne.s32.totalorder %s2746_s20, %s2742_s19 }
   0x6   : > { %p143_p1 = scmp.eq.s32.totalorder %s142_s26, 0  ;;  %p156_p2 = scmp.eq.s32.totalorder %s2811_s22, 1 }
   0x7   : > { %p161_p3 = scmp.ne.s32.totalorder %s2742_s19, %s2738_s18  ;;  %p162_p4 = scmp.eq.s32.totalorder %s2311_s23, 1 }
   0x8   : > { %s2826_s27 = scalar_select %p143_p1, %s2746_s20, %s145_s25  }
   0x9   : > { %p2828_p5 = por %p156_p2, %p155_p0  ;;  %p2832_p6 = por %p162_p4, %p161_p3 }
   0xa   : > { %p2314_p7 = scmp.ge.s32.totalorder %s2750_s21, 1  ;;  %p214_p8 = scmp.lt.s32.totalorder %s2750_s21, 3 }
   0xc   : > { %p215_p9 = pnand %p2314_p7, %p214_p8 }
   0xd   : > { %s2316_s9 = sshll.u32 (!%p215_p9), %s2811_s22, 3  ;;  %s2756_s13 = smov (!%p215_p9), 64  }
   0xe   : > { %218 = sbr.rel (%p215_p9) target bundleno = 848 (0x350), region = 40  ;;  %p254_p10 = scmp.lt.s32.totalorder (!%p215_p9), %s2316_s9, 15 }
   0xf   : > { %s2757_s14 = smov (!%p215_p9), 32   ;;  %s2758_s15 = smov (!%p215_p9), 96  }
  0x10   : > { %s250_s16 = sand.u32 (!%p215_p9), 1, %s2742_s19  }
  0x11   : > { %s2315_s17 = sshll.u32 (!%p215_p9), %s250_s16, 4 }
  0x13   : > { %v275_v0 = vld [vmem:[%s3177_s3 + $0x18] sm:$0xff]  ;;  %v274_v1 = vld [vmem:[%s3177_s3 + $0x10] sm:$0xff]  ;;  %v277_v2 = vld [vmem:[%s3178_s4 + $0x8] sm:$0xff]  ;;  %s3187_s9 = smov (!%p254_p10, %s2316_s9), 15  ;;  %vm286_vm0 = vcmask 261120   ;;  %v2752_v6 = vmov 0.0  }
  0x14   : > { %2448 = vmatprep.subr.mxu0 %v275_v0  ;;  %v276_v3 = vld [vmem:[%s3178_s4] sm:$0xff]  ;;  %v273_v4 = vld [vmem:[%s3177_s3 + $0x8] sm:$0xff]  ;;  %2468 = vmatprep.subr.mxu1 %v277_v2  ;;  %s2317_s23 = sshll.u32 %s3187_s9, 3  ;;  %s2368_s25 = sshll.u32 %s3187_s9, 5  ;;  %vm424_vm1 = vcmask 130048   ;;  %vm2753_vm2 = vmmov 0  }
  0x15   : > { %2449 = vmatpush3.msra.mxu0 %v275_v0  ;;  %2469 = vmatpush3.msra.mxu1 %v277_v2  ;;  %v272_v5 = vld [vmem:[%s3177_s3] sm:$0xff]  ;;  %s2860_s6 = scalar_lea.vmem %s3174_s0, %s2317_s23  ;;  %s2866_s9 = scalar_lea.vmem %s3175_s1, %s2368_s25  ;;  %vm1170_vm3 = vcmask 64512   ;;  %vm2204_vm4 = vcmask 523264   ;;  %vm2206_vm5 = vcmask 785408  }
  0x16   : > { %2450 = vmatprep.subr.mxu0 %v274_v1  ;;  %2470 = vmatprep.subr.mxu1 %v276_v3  ;;  %v278_v7 = vld [vmem:[%s2860_s6] sm:$0xff]  ;;  %v279_v8 = vld [vmem:[%s2860_s6 + $0x8] sm:$0xff]  ;;  %v280_v9 = vld [vmem:[%s2860_s6 + $0x10] sm:$0xff]  ;;  %s2874_s12 = scalar_lea.vmem %s3176_s2, %s2317_s23  ;;  %s2369_s23 = sshll.u32 %s2811_s22, 8 }
  0x17   : > { %2451 = vmatpush3.msra.mxu0 %v274_v1  ;;  %2471 = vmatpush3.msra.mxu1 %v276_v3  ;;  %v281_v10 = vld [vmem:[%s2860_s6 + $0x18] sm:$0xff]  ;;  %v416_v11 = vld [vmem:[%s2874_s12] sm:$0xff]  ;;  %v417_v12 = vld [vmem:[%s2874_s12 + $0x8] sm:$0xff]  ;;  %s252_s25 = scalar_lea.vmem [#allocation2], %s2315_s17  ;;  %s3133_s7 = scalar_lea.hbm %s3179_s5, %s2369_s23 }
  0x18   : > { %2452 = vmatprep.subr.mxu0 %v273_v4  ;;  %2484 = vmatprep.subr.mxu1 %v2752_v6  ;;  %v557_v13 = vld [vmem:[%s2866_s9 + $0x18] sm:$0xff]  ;;  %v282_v15 = vld [vmem:[%s2860_s6 + $0x20] sm:$0xff]  ;;  %v418_v16 = vld [vmem:[%s2874_s12 + $0x10] sm:$0xff]  ;;  %s2228_s26 = sshll.u32 %s252_s25, 4  ;;  %s2214_s22 = scalar_lea.sflag [#allocation3], %s250_s16  ;;  %s3135_s26 = int_to_ptr.vmem [resolvable:$true] %s2228_s26 }
  0x19   : > { %2453 = vmatpush3.msra.mxu0 %v273_v4  ;;  %2456 = vmatprep.mubr.msk.f32.mxu0 %vm286_vm0, %v278_v7  ;;  %v561_v14 = vld [vmem:[%s2866_s9 + $0x38] sm:$0xff]  ;;  %v560_v18 = vld [vmem:[%s2866_s9 + $0x30] sm:$0xff]  ;;  %v420_v20 = vld [vmem:[%s2874_s12 + $0x20] sm:$0xff]  ;;  %s2690_s8 = scalar_lea.vmem %s3135_s26, 256 }
  0x1a   : > { %2454 = vmatprep.subr.mxu0 %v272_v5  ;;  %2472 = vmatprep.mubr.msk.f32.mxu1 %vm424_vm1, %v416_v11  ;;  %v419_v17 = vld [vmem:[%s2874_s12 + $0x18] sm:$0xff]  ;;  %v556_v19 = vld [vmem:[%s2866_s9 + $0x10] sm:$0xff]  ;;  %v283_v21 = vld [vmem:[%s2860_s6 + $0x28] sm:$0xff]  ;;  %p2691_p11 = scmp.ne.s32.totalorder %s3135_s26, %s2690_s8 }
  0x1b   : > { %2455 = vmatpush3.msra.mxu0 %v272_v5  ;;  %2473 = vmatmul.mubr.msk.f32.vlgmr.msra.gmra.mxu1 %vm424_vm1, %v417_v12  ;;  %v284_v22 = vld [vmem:[%s2860_s6 + $0x30] sm:$0xff]  ;;  %v421_v23 = vld [vmem:[%s2874_s12 + $0x28] sm:$0xff]  ;;  %v285_v27 = vld [vmem:[%s2860_s6 + $0x38] sm:$0xff] }
  0x1c   : > { %2457 = vmatmul.mubr.msk.f32.vlgmr.msra.gmra.mxu0 %vm286_vm0, %v279_v8  ;;  %2495 = vmatprep.subr.mxu0 %v2752_v6  ;;  %v559_v24 = vld [vmem:[%s2866_s9 + $0x28] sm:$0xff]  ;;  %v422_v26 = vld [vmem:[%s2874_s12 + $0x30] sm:$0xff]  ;;  %v554_v28 = vld [vmem:[%s2866_s9] sm:$0xff]  ;;  %p2692_p12 = pnand %p2691_p11, %p2828_p5 }
  0x1d   : > { %2459 = vmatprep.mubr.msk.f32.mxu0 %vm286_vm0, %v280_v9  ;;  %2496 = vmatpush3.msra.mxu0 %v561_v14  ;;  %v555_v25 = vld [vmem:[%s2866_s9 + $0x8] sm:$0xff]  ;;  %v423_v29 = vld [vmem:[%s2874_s12 + $0x38] sm:$0xff]  ;;  %v558_v30 = vld [vmem:[%s2866_s9 + $0x20] sm:$0xff] }
  0x1e   : > { %2485 = vmatpush3.msra.mxu1 %v557_v13  ;;  %2475 = vmatprep.mubr.msk.f32.mxu1 %vm424_vm1, %v418_v16  ;;  %v569_v31 = vld [vmem:[%s2866_s9 + $0x78] sm:$0xff]  ;;  %v568_v34 = vld [vmem:[%s2866_s9 + $0x70] sm:$0xff]  ;;  %v567_v37 = vld [vmem:[%s2866_s9 + $0x68] sm:$0xff]  ;;  %p2693_p13 = pneg %p2692_p12 }
  0x1f   : > { %2486 = vmatprep.subr.mxu1 %v2752_v6  ;;  %2497 = vmatprep.subr.mxu0 %v2752_v6  ;;  %v565_v33 = vld [vmem:[%s2866_s9 + $0x58] sm:$0xff]  ;;  %v564_v36 = vld [vmem:[%s2866_s9 + $0x50] sm:$0xff]  ;;  %v563_v39 = vld [vmem:[%s2866_s9 + $0x48] sm:$0xff] }
  0x20   : > { %2460 = vmatmul.mubr.msk.f32.gmra.mxu0 %vm286_vm0, %v281_v10  ;;  %2476 = vmatmul.mubr.msk.f32.gmra.mxu1 %vm424_vm1, %v419_v17  ;;  %v566_v40 = vld [vmem:[%s2866_s9 + $0x60] sm:$0xff]  ;;  %v577_v42 = vld [vmem:[%s2866_s9 + $0xb8] sm:$0xff]  ;;  %v576_v45 = vld [vmem:[%s2866_s9 + $0xb0] sm:$0xff] }
  0x21   : > { %2462 = vmatprep.mubr.msk.f32.mxu0 %vm286_vm0, %v282_v15  ;;  %2498 = vmatpush3.msra.mxu0 %v560_v18  ;;  %v562_v41 = vld [vmem:[%s2866_s9 + $0x40] sm:$0xff]  ;;  %v573_v44 = vld [vmem:[%s2866_s9 + $0x98] sm:$0xff]  ;;  %v572_v46 = vld [vmem:[%s2866_s9 + $0x90] sm:$0xff] }
  0x22   : > { %2487 = vmatpush3.msra.mxu1 %v556_v19  ;;  %2478 = vmatprep.mubr.msk.f32.mxu1 %vm424_vm1, %v420_v20  ;;  %v575_v47 = vld [vmem:[%s2866_s9 + $0xa8] sm:$0xff]  ;;  %v574_v50 = vld [vmem:[%s2866_s9 + $0xa0] sm:$0xff]  ;;  %v585_v52 = vld [vmem:[%s2866_s9 + $0xf8] sm:$0xff] }
  0x23   : > { %2488 = vmatprep.subr.mxu1 %v2752_v6  ;;  %2499 = vmatprep.subr.mxu0 %v2752_v6  ;;  %v571_v48 = vld [vmem:[%s2866_s9 + $0x88] sm:$0xff]  ;;  %v570_v51 = vld [vmem:[%s2866_s9 + $0x80] sm:$0xff]  ;;  %v581_v54 = vld [vmem:[%s2866_s9 + $0xd8] sm:$0xff] }
  0x24   : > { %2463 = vmatmul.mubr.msk.f32.gmra.mxu0 %vm286_vm0, %v283_v21  ;;  %2479 = vmatmul.mubr.msk.f32.gmra.mxu1 %vm424_vm1, %v421_v23  ;;  %v584_v55 = vld [vmem:[%s2866_s9 + $0xf0] sm:$0xff]  ;;  %v583_v57 = vld [vmem:[%s2866_s9 + $0xe8] sm:$0xff]  ;;  %v582_v59 = vld [vmem:[%s2866_s9 + $0xe0] sm:$0xff] }
  0x25   : > { %2465 = vmatprep.mubr.msk.f32.mxu0 %vm286_vm0, %v284_v22  ;;  %2500 = vmatpush3.msra.mxu0 %v559_v24  ;;  %v580_v56 = vld [vmem:[%s2866_s9 + $0xd0] sm:$0xff]  ;;  %v579_v58 = vld [vmem:[%s2866_s9 + $0xc8] sm:$0xff]  ;;  %v578_v62 = vld [vmem:[%s2866_s9 + $0xc0] sm:$0xff]  ;;  %s2759_s9 = smov [#allocation2]  }
  0x26   : > { %2489 = vmatpush3.msra.mxu1 %v555_v25  ;;  %2481 = vmatprep.mubr.msk.f32.mxu1 %vm424_vm1, %v422_v26  ;;  %s2694_s10 = sshll.u32 %s2759_s9, 4  ;;  %s2695_s10 = int_to_ptr.vmem [resolvable:$false] %s2694_s10 }
  0x27   : > { %2490 = vmatprep.subr.mxu1 %v2752_v6  ;;  %2501 = vmatprep.subr.mxu0 %v2752_v6  ;;  %s2696_s11 = scalar_lea.vmem %s2695_s10, 512  ;;  %p2697_p0 = scmp.lt.s32.totalorder %s3135_s26, %s2695_s10 }
  0x28   : > { %2466 = vmatmul.mubr.msk.f32.gmra.mxu0 %vm286_vm0, %v285_v27  ;;  %2491 = vmatpush3.msra.mxu1 %v554_v28  ;;  %p2698_p1 = scmp.lt.s32.totalorder %s2696_s11, %s2690_s8 }
  0x29   : > { %2482 = vmatmul.mubr.msk.f32.gmra.mxu1 %vm424_vm1, %v423_v29  ;;  %2502 = vmatpush3.msra.mxu0 %v558_v30 }
  0x2a   : > { %2517 = vmatprep.subr.mxu0 %v2752_v6  ;;  %2506 = vmatprep.subr.mxu1 %v2752_v6  ;;  %p2699_p2 = por %p2698_p1, %p2697_p0 }
  0x2b   : > { %2503 = vmatprep.mubr.msk.f32.mxu0 %vm2753_vm2, %v2752_v6  ;;  %2492 = vmatprep.mubr.msk.f32.mxu1 %vm2753_vm2, %v2752_v6 }
  0x2c   : > { %p2700_p3 = pnand %p2699_p2, %p2693_p13 }
  0xdb   : > { %v2474_v60 = vpop.f32.mrf.mxu1 }
  0xdc   : > { %v2458_v32 = vpop.f32.mrf.mxu0 }
  0xdd   : > { %2504 = vmatmul.mubr.msk.f32.vlgmr.msra.gmra.mxu0 %vm286_vm0, %v2458_v32  ;;  %v515_v63 = vpop.f32.mrf.mxu1 }
  0xde   : > { %2518 = vmatpush3.msra.mxu0 %v569_v31  ;;  %v377_v35 = vpop.f32.mrf.mxu0  ;;  %2525 = vmatprep.mubr.msk.f32.mxu0 %vm2753_vm2, %v2752_v6 }
  0xdf   : > { %2519 = vmatprep.subr.mxu0 %v2752_v6  ;;  %2493 = vmatmul.mubr.msk.f32.vlgmr.msra.gmra.mxu1 %vm286_vm0, %v377_v35 }
  0xe0   : > { %2507 = vmatpush3.msra.mxu1 %v565_v33  ;;  %2520 = vmatpush3.msra.mxu0 %v568_v34  ;;  %v2461_v38 = vpop.f32.mrf.mxu0  ;;  %v3000_v1 = vpop.f32.mrf.mxu1 }
  0xe1   : > { %2508 = vmatprep.subr.mxu1 %v2752_v6  ;;  %2521 = vmatprep.subr.mxu0 %v2752_v6 }
  0xe2   : > { %2509 = vmatpush3.msra.mxu1 %v564_v36  ;;  %2522 = vmatpush3.msra.mxu0 %v567_v37  ;;  %v387_v43 = vpop.f32.mrf.mxu0  ;;  %v3002_v2 = vpop.f32.mrf.mxu1 }
  0xe3   : > { %2510 = vmatprep.subr.mxu1 %v2752_v6  ;;  %2523 = vmatprep.subr.mxu0 %v2752_v6 }
  0xe4   : > { %2511 = vmatpush3.msra.mxu1 %v563_v39  ;;  %2524 = vmatpush3.msra.mxu0 %v566_v40  ;;  %v2464_v49 = vpop.f32.mrf.mxu0  ;;  %v3004_v3 = vpop.f32.mrf.mxu1 }
  0xe5   : > { %2512 = vmatprep.subr.mxu1 %v2752_v6  ;;  %2526 = vmatmul.mubr.msk.f32.vlgmr.msra.gmra.mxu0 %vm286_vm0, %v2461_v38 }
  0xe6   : > { %2539 = vmatprep.subr.mxu0 %v2752_v6  ;;  %2513 = vmatpush3.msra.mxu1 %v562_v41  ;;  %v397_v53 = vpop.f32.mrf.mxu0  ;;  %v3006_v4 = vpop.f32.mrf.mxu1 }
  0xe7   : > { %2514 = vmatprep.mubr.msk.f32.mxu1 %vm2753_vm2, %v2752_v6  ;;  %2540 = vmatpush3.msra.mxu0 %v577_v42 }
  0xe8   : > { %2515 = vmatmul.mubr.msk.f32.vlgmr.msra.gmra.mxu1 %vm286_vm0, %v387_v43  ;;  %2528 = vmatprep.subr.mxu1 %v2752_v6  ;;  %v2467_v61 = vpop.f32.mrf.mxu0 }
  0xe9   : > { %2541 = vmatprep.subr.mxu0 %v2752_v6  ;;  %2529 = vmatpush3.msra.mxu1 %v573_v44  ;;  %v3008_v5 = vpop.f32.mrf.mxu1 }
  0xea   : > { %2542 = vmatpush3.msra.mxu0 %v576_v45  ;;  %2530 = vmatprep.subr.mxu1 %v2752_v6  ;;  %v407_v0 = vpop.f32.mrf.mxu0 }
  0xeb   : > { %2543 = vmatprep.subr.mxu0 %v2752_v6  ;;  %2531 = vmatpush3.msra.mxu1 %v572_v46  ;;  %v3010_v7 = vpop.f32.mrf.mxu1 }
  0xec   : > { %2544 = vmatpush3.msra.mxu0 %v575_v47  ;;  %2532 = vmatprep.subr.mxu1 %v2752_v6 }
  0xed   : > { %2545 = vmatprep.subr.mxu0 %v2752_v6  ;;  %2533 = vmatpush3.msra.mxu1 %v571_v48 }
  0xee   : > { %2546 = vmatpush3.msra.mxu0 %v574_v50  ;;  %2547 = vmatprep.mubr.msk.f32.mxu0 %vm2753_vm2, %v2752_v6 }
  0xef   : > { %2534 = vmatprep.subr.mxu1 %v2752_v6  ;;  %2548 = vmatmul.mubr.msk.f32.vlgmr.msra.gmra.mxu0 %vm286_vm0, %v2464_v49 }
  0xf0   : > { %2561 = vmatprep.subr.mxu0 %v2752_v6  ;;  %2535 = vmatpush3.msra.mxu1 %v570_v51 }
  0xf1   : > { %2536 = vmatprep.mubr.msk.f32.mxu1 %vm2753_vm2, %v2752_v6  ;;  %2562 = vmatpush3.msra.mxu0 %v585_v52 }
  0xf2   : > { %2537 = vmatmul.mubr.msk.f32.vlgmr.msra.gmra.mxu1 %vm286_vm0, %v397_v53  ;;  %2550 = vmatprep.subr.mxu1 %v2752_v6 }
  0xf3   : > { %2563 = vmatprep.subr.mxu0 %v2752_v6  ;;  %2551 = vmatpush3.msra.mxu1 %v581_v54 }
  0xf4   : > { %2564 = vmatpush3.msra.mxu0 %v584_v55  ;;  %2552 = vmatprep.subr.mxu1 %v2752_v6 }
  0xf5   : > { %2565 = vmatprep.subr.mxu0 %v2752_v6  ;;  %2553 = vmatpush3.msra.mxu1 %v580_v56 }
  0xf6   : > { %2566 = vmatpush3.msra.mxu0 %v583_v57  ;;  %2554 = vmatprep.subr.mxu1 %v2752_v6 }
  0xf7   : > { %2567 = vmatprep.subr.mxu0 %v2752_v6  ;;  %2555 = vmatpush3.msra.mxu1 %v579_v58 }
  0xf8   : > { %2568 = vmatpush3.msra.mxu0 %v582_v59  ;;  %2569 = vmatprep.mubr.msk.f32.mxu0 %vm2753_vm2, %v2752_v6 }
  0xf9   : > { %2556 = vmatprep.subr.mxu1 %v2752_v6  ;;  %2570 = vmatmul.mubr.msk.f32.vlgmr.msra.gmra.mxu0 %vm286_vm0, %v2467_v61 }
  0xfa   : > { %2557 = vmatpush3.msra.mxu1 %v578_v62  ;;  %2558 = vmatprep.mubr.msk.f32.mxu1 %vm2753_vm2, %v2752_v6 }
  0xfb   : > { %2559 = vmatmul.mubr.msk.f32.vlgmr.msra.gmra.mxu1 %vm286_vm0, %v407_v0  ;;  %2572 = vmatprep.subr.mxu1 %v2752_v6 }
  0xfc   : > { %2577 = vmatprep.subr.mxu0 %v2752_v6  ;;  %2573 = vmatpush3.msra.mxu1 %v515_v63 }
  0xfd   : > { %2578 = vmatpush3.msra.mxu0 %v2474_v60  ;;  %2579 = vmatprep.mubr.msk.f32.mxu0 %vm2753_vm2, %v2752_v6 }
  0xfe   : > { %2587 = vmatprep.subr.mxu0 %v2752_v6  ;;  %2574 = vmatprep.mubr.msk.f32.mxu1 %vm2753_vm2, %v2752_v6 }
  0xff   : > { %2582 = vmatprep.subr.mxu1 %v2752_v6 }
 0x19d   : > { %v728_v8 = vpop.f32.mrf.mxu0 }
 0x19e   : > { %v1178_v9 = vsel %vm1170_vm3, %v728_v8, -inf }
 0x19f   : > { %v1179_v10 = vrot.slane %v1178_v9, 4  ;;  %v655_v11 = vpop.f32.mrf.mxu1  ;;  %v2505_v12 = vpop.f32.mrf.mxu0 }
 0x1a0   : > { %v1171_v13 = vsel %vm1170_vm3, %v655_v11, -inf }
 0x1a1   : > { %v1180_v14 = vmax.f32 %v1178_v9, %v1179_v10  ;;  %v1172_v15 = vrot.slane %v1171_v13, 4  ;;  %v2494_v16 = vpop.f32.mrf.mxu1 }
 0x1a3   : > { %v1181_v17 = vrot.slane %v1180_v14, 2  ;;  %v1173_v18 = vmax.f32 %v1171_v13, %v1172_v15 }
 0x1a5   : > { %v1182_v19 = vmax.f32 %v1180_v14, %v1181_v17  ;;  %v1174_v20 = vrot.slane %v1173_v18, 2  ;;  %v874_v21 = vpop.f32.mrf.mxu0 }
 0x1a6   : > { %v1192_v22 = vsel %vm1170_vm3, %v874_v21, -inf }
 0x1a7   : > { %v1183_v23 = vrot.slane %v1182_v19, 1  ;;  %v1175_v24 = vmax.f32 %v1173_v18, %v1174_v20  ;;  %v1193_v25 = vrot.slane %v1192_v22, 4  ;;  %v2527_v26 = vpop.f32.mrf.mxu0 }
 0x1a8   : > { %v801_v27 = vpop.f32.mrf.mxu1 }
 0x1a9   : > { %v1184_v28 = vmax.f32 %v1182_v19, %v1183_v23  ;;  %v1176_v29 = vrot.slane %v1175_v24, 1  ;;  %v1194_v30 = vmax.f32 %v1192_v22, %v1193_v25  ;;  %v1185_v31 = vsel %vm1170_vm3, %v801_v27, -inf }
 0x1aa   : > { %v1186_v32 = vrot.slane %v1185_v31, 4  ;;  %v2516_v33 = vpop.f32.mrf.mxu1 }
 0x1ab   : > { %v1228_v34 = vsub.f32 %v728_v8, %v1184_v28  ;;  %v1177_v35 = vmax.f32 %v1175_v24, %v1176_v29  ;;  %v1195_v36 = vrot.slane %v1194_v30, 2 }
 0x1ac   : > { %v1187_v37 = vmax.f32 %v1185_v31, %v1186_v32 }
 0x1ad   : > { %v1237_v38 = vmul.f32 1.442695, %v1228_v34  ;;  %v1227_v39 = vsub.f32 %v655_v11, %v1177_v35  ;;  %v1196_v40 = vmax.f32 %v1194_v30, %v1195_v36 }
 0x1ae   : > { %v1188_v41 = vrot.slane %v1187_v37, 2 }
 0x1af   : > { %2658 = vpow2.f32 %v1237_v38  ;;  %v1235_v42 = vmul.f32 1.442695, %v1227_v39  ;;  %v1197_v43 = vrot.slane %v1196_v40, 1  ;;  %v1020_v44 = vpop.f32.mrf.mxu0 }
 0x1b0   : > { %v1189_v45 = vmax.f32 %v1187_v37, %v1188_v41  ;;  %v1206_v46 = vsel %vm1170_vm3, %v1020_v44, -inf }
 0x1b1   : > { %2660 = vpow2.f32 %v1235_v42  ;;  %v1198_v47 = vmax.f32 %v1196_v40, %v1197_v43  ;;  %v1207_v48 = vrot.slane %v1206_v46, 4  ;;  %v2549_v49 = vpop.f32.mrf.mxu0 }
 0x1b2   : > { %v1190_v50 = vrot.slane %v1189_v45, 1  ;;  %v947_v51 = vpop.f32.mrf.mxu1 }
 0x1b3   : > { %v1230_v52 = vsub.f32 %v874_v21, %v1198_v47  ;;  %v1208_v53 = vmax.f32 %v1206_v46, %v1207_v48  ;;  %v1199_v54 = vsel %vm1170_vm3, %v947_v51, -inf }
 0x1b4   : > { %v1191_v55 = vmax.f32 %v1189_v45, %v1190_v50  ;;  %v1200_v56 = vrot.slane %v1199_v54, 4  ;;  %v2538_v57 = vpop.f32.mrf.mxu1 }
 0x1b5   : > { %v1241_v58 = vmul.f32 1.442695, %v1230_v52  ;;  %v1209_v59 = vrot.slane %v1208_v53, 2 }
 0x1b6   : > { %v1229_v60 = vsub.f32 %v801_v27, %v1191_v55  ;;  %v1201_v61 = vmax.f32 %v1199_v54, %v1200_v56 }
 0x1b7   : > { %2662 = vpow2.f32 %v1241_v58  ;;  %v1210_v62 = vmax.f32 %v1208_v53, %v1209_v59 }
 0x1b8   : > { %v1239_v63 = vmul.f32 1.442695, %v1229_v60  ;;  %v1202_v0 = vrot.slane %v1201_v61, 2 }
 0x1b9   : > { %v1211_v8 = vrot.slane %v1210_v62, 1  ;;  %v1166_v9 = vpop.f32.mrf.mxu0 }
 0x1ba   : > { %2664 = vpow2.f32 %v1239_v63  ;;  %v1203_v10 = vmax.f32 %v1201_v61, %v1202_v0  ;;  %v1220_v11 = vsel %vm1170_vm3, %v1166_v9, -inf }
 0x1bb   : > { %v1212_v12 = vmax.f32 %v1210_v62, %v1211_v8  ;;  %v1221_v13 = vrot.slane %v1220_v11, 4  ;;  %v1093_v14 = vpop.f32.mrf.mxu1  ;;  %v2571_v15 = vpop.f32.mrf.mxu0 }
 0x1bc   : > { %v3019_v16 = vpop.eup %2658  ;;  %v1204_v17 = vrot.slane %v1203_v10, 1  ;;  %v1213_v18 = vsel %vm1170_vm3, %v1093_v14, -inf }
 0x1bd   : > { %v1258_v19 = vsel %vm1170_vm3, %v3019_v16, 0.0  ;;  %v1232_v20 = vsub.f32 %v1020_v44, %v1212_v12  ;;  %v1222_v21 = vmax.f32 %v1220_v11, %v1221_v13  ;;  %v1214_v22 = vrot.slane %v1213_v18, 4  ;;  %v2560_v23 = vpop.f32.mrf.mxu1 }
 0x1be   : > { %v3024_v24 = vpop.eup %2660  ;;  %v1259_v25 = vrot.slane %v1258_v19, 4  ;;  %v1205_v26 = vmax.f32 %v1203_v10, %v1204_v17 }
 0x1bf   : > { %v1251_v27 = vsel %vm1170_vm3, %v3024_v24, 0.0  ;;  %v1245_v28 = vmul.f32 1.442695, %v1232_v20  ;;  %v1223_v29 = vrot.slane %v1222_v21, 2  ;;  %v1215_v30 = vmax.f32 %v1213_v18, %v1214_v22 }
 0x1c0   : > { %v1260_v31 = vadd.f32 %v1259_v25, %v1258_v19  ;;  %v1252_v32 = vrot.slane %v1251_v27, 4  ;;  %v1231_v33 = vsub.f32 %v947_v51, %v1205_v26 }
 0x1c1   : > { %2666 = vpow2.f32 %v1245_v28  ;;  %v1224_v34 = vmax.f32 %v1222_v21, %v1223_v29  ;;  %v1216_v35 = vrot.slane %v1215_v30, 2 }
 0x1c2   : > { %v1261_v36 = vrot.slane %v1260_v31, 2  ;;  %v1253_v37 = vadd.f32 %v1252_v32, %v1251_v27  ;;  %v1243_v38 = vmul.f32 1.442695, %v1231_v33 }
 0x1c3   : > { %v1225_v39 = vrot.slane %v1224_v34, 1  ;;  %v1217_v40 = vmax.f32 %v1215_v30, %v1216_v35 }
 0x1c4   : > { %v3028_v41 = vpop.eup %2662  ;;  %v1262_v42 = vadd.f32 %v1261_v36, %v1260_v31  ;;  %v1254_v43 = vrot.slane %v1253_v37, 2  ;;  %2668 = vpow2.f32 %v1243_v38 }
 0x1c5   : > { %v1272_v44 = vsel %vm1170_vm3, %v3028_v41, 0.0  ;;  %v1226_v45 = vmax.f32 %v1224_v34, %v1225_v39  ;;  %v1218_v46 = vrot.slane %v1217_v40, 1 }
 0x1c6   : > { %v1263_v47 = vrot.slane %v1262_v42, 1  ;;  %v1255_v48 = vadd.f32 %v1254_v43, %v1253_v37  ;;  %v1273_v49 = vrot.slane %v1272_v44, 4 }
 0x1c7   : > { %v3032_v50 = vpop.eup %2664  ;;  %v1234_v51 = vsub.f32 %v1166_v9, %v1226_v45  ;;  %v1219_v52 = vmax.f32 %v1217_v40, %v1218_v46 }
 0x1c8   : > { %v1264_v53 = vadd.f32 %v1263_v47, %v1262_v42  ;;  %v1256_v54 = vrot.slane %v1255_v48, 1  ;;  %v1274_v55 = vadd.f32 %v1273_v49, %v1272_v44  ;;  %v1265_v56 = vsel %vm1170_vm3, %v3032_v50, 0.0 }
 0x1c9   : > { %v1266_v57 = vrot.slane %v1265_v56, 4  ;;  %v1249_v58 = vmul.f32 1.442695, %v1234_v51  ;;  %v1233_v59 = vsub.f32 %v1093_v14, %v1219_v52 }
 0x1ca   : > { %2670 = vrcp.f32 %v1264_v53  ;;  %v1257_v60 = vadd.f32 %v1256_v54, %v1255_v48  ;;  %v1275_v61 = vrot.slane %v1274_v55, 2 }
 0x1cb   : > { %v1267_v62 = vadd.f32 %v1266_v57, %v1265_v56  ;;  %2672 = vpow2.f32 %v1249_v58  ;;  %v1247_v63 = vmul.f32 1.442695, %v1233_v59 }
 0x1cc   : > { %2674 = vrcp.f32 %v1257_v60  ;;  %v1276_v0 = vadd.f32 %v1275_v61, %v1274_v55  ;;  %v2754_v60 = vmov 1983009808  }
 0x1cd   : > { %v1268_v8 = vrot.slane %v1267_v62, 2  ;;  %2676 = vpow2.f32 %v1247_v63  ;;  %v1910_v61 = vunpack.c.l.s4 %v2754_v60 }
 0x1ce   : > { %v3036_v9 = vpop.eup %2666  ;;  %v1277_v10 = vrot.slane %v1276_v0, 1 }
 0x1cf   : > { %v1269_v11 = vadd.f32 %v1268_v8, %v1267_v62  ;;  %v1286_v12 = vsel %vm1170_vm3, %v3036_v9, 0.0  ;;  %v1912_v62 = vlaneseq  ;;  %v1911_v8 = vunpack.c.0.s8 %v1910_v61 }
 0x1d0   : > { %v1278_v13 = vadd.f32 %v1277_v10, %v1276_v0  ;;  %v1287_v15 = vrot.slane %v1286_v12, 4  ;;  %v2755_v0 = vmov 1934713408  }
 0x1d1   : > { %v3040_v14 = vpop.eup %2668  ;;  %v1270_v17 = vrot.slane %v1269_v11, 1 }
 0x1d2   : > { %2678 = vrcp.f32 %v1278_v13  ;;  %v1288_v18 = vadd.f32 %v1287_v15, %v1286_v12  ;;  %v1279_v19 = vsel %vm1170_vm3, %v3040_v14, 0.0 }
 0x1d3   : > { %v1271_v20 = vadd.f32 %v1270_v17, %v1269_v11  ;;  %v1280_v21 = vrot.slane %v1279_v19, 4 }
 0x1d4   : > { %v1289_v22 = vrot.slane %v1288_v18, 2 }
 0x1d5   : > { %2680 = vrcp.f32 %v1271_v20  ;;  %v1281_v23 = vadd.f32 %v1280_v21, %v1279_v19 }
 0x1d6   : > { %v1290_v25 = vadd.f32 %v1289_v22, %v1288_v18 }
 0x1d7   : > { %v2671_v26 = vpop.eup %2670  ;;  %v1282_v27 = vrot.slane %v1281_v23, 2 }
 0x1d8   : > { %v2673_v28 = vpop.eup %2672  ;;  %v1291_v29 = vrot.slane %v1290_v25, 1  ;;  %v1310_v30 = vmul.f32 %v2671_v26, %v3019_v16 }
 0x1d9   : > { %v2675_v31 = vpop.eup %2674  ;;  %v1283_v32 = vadd.f32 %v1282_v27, %v1281_v23  ;;  %v1300_v33 = vsel %vm1170_vm3, %v2673_v28, 0.0 }
 0x1da   : > { %v2677_v34 = vpop.eup %2676  ;;  %v1292_v35 = vadd.f32 %v1291_v29, %v1290_v25  ;;  %v1301_v36 = vrot.slane %v1300_v33, 4  ;;  %2580 = vmatmul.mubr.msk.f32.vlgmr.msra.gmra.mxu0 %vm1170_vm3, %v1310_v30  ;;  %v1308_v37 = vmul.f32 %v2675_v31, %v3024_v24 }
 0x1db   : > { %v1284_v38 = vrot.slane %v1283_v32, 1  ;;  %v1293_v39 = vsel %vm1170_vm3, %v2677_v34, 0.0  ;;  %2588 = vmatpush3.msra.mxu0 %v3000_v1  ;;  %2589 = vmatprep.mubr.msk.f32.mxu0 %vm2753_vm2, %v2752_v6 }
 0x1dc   : > { %2682 = vrcp.f32 %v1292_v35  ;;  %v1302_v16 = vadd.f32 %v1301_v36, %v1300_v33  ;;  %v1294_v40 = vrot.slane %v1293_v39, 4  ;;  %2575 = vmatmul.mubr.msk.f32.vlgmr.msra.gmra.mxu1 %vm1170_vm3, %v1308_v37  ;;  %2597 = vmatprep.subr.mxu0 %v2752_v6 }
 0x1dd   : > { %v1285_v42 = vadd.f32 %v1284_v38, %v1283_v32  ;;  %2583 = vmatpush3.msra.mxu1 %v3002_v2  ;;  %2584 = vmatprep.mubr.msk.f32.mxu1 %vm2753_vm2, %v2752_v6 }
 0x1de   : > { %v1303_v24 = vrot.slane %v1302_v16, 2  ;;  %v1295_v43 = vadd.f32 %v1294_v40, %v1293_v39  ;;  %2592 = vmatprep.subr.mxu1 %v2752_v6 }
 0x1df   : > { %v2679_v1 = vpop.eup %2678  ;;  %2684 = vrcp.f32 %v1285_v42 }
 0x1e0   : > { %v1304_v44 = vadd.f32 %v1303_v24, %v1302_v16  ;;  %v1296_v45 = vrot.slane %v1295_v43, 2  ;;  %v1314_v46 = vmul.f32 %v2679_v1, %v3028_v41 }
 0x1e2   : > { %v2681_v47 = vpop.eup %2680  ;;  %v1305_v48 = vrot.slane %v1304_v44, 1  ;;  %v1297_v49 = vadd.f32 %v1296_v45, %v1295_v43  ;;  %2590 = vmatmul.mubr.msk.f32.vlgmr.msra.gmra.mxu0 %vm1170_vm3, %v1314_v46 }
 0x1e3   : > { %2598 = vmatpush3.msra.mxu0 %v3004_v3  ;;  %v1312_v2 = vmul.f32 %v2681_v47, %v3032_v50  ;;  %2599 = vmatprep.mubr.msk.f32.mxu0 %vm2753_vm2, %v2752_v6 }
 0x1e4   : > { %v1306_v51 = vadd.f32 %v1305_v48, %v1304_v44  ;;  %v1298_v52 = vrot.slane %v1297_v49, 1  ;;  %2607 = vmatprep.subr.mxu0 %v2752_v6 }
 0x1e5   : > { %2585 = vmatmul.mubr.msk.f32.vlgmr.msra.gmra.mxu1 %vm1170_vm3, %v1312_v2 }
 0x1e6   : > { %2686 = vrcp.f32 %v1306_v51  ;;  %v1299_v41 = vadd.f32 %v1298_v52, %v1297_v49  ;;  %2593 = vmatpush3.msra.mxu1 %v3006_v4  ;;  %2594 = vmatprep.mubr.msk.f32.mxu1 %vm2753_vm2, %v2752_v6 }
 0x1e7   : > { %2602 = vmatprep.subr.mxu1 %v2752_v6 }
 0x1e8   : > { %2688 = vrcp.f32 %v1299_v41 }
 0x1e9   : > { %v2683_v3 = vpop.eup %2682 }
 0x1ea   : > { %v1318_v50 = vmul.f32 %v2683_v3, %v3036_v9  ;;  %v1913_v9 = vshrl.u32 %v1912_v62, 7 }
 0x1ec   : > { %v2685_v53 = vpop.eup %2684  ;;  %2600 = vmatmul.mubr.msk.f32.vlgmr.msra.gmra.mxu0 %vm1170_vm3, %v1318_v50  ;;  %v3082_v11 = vsub.s32 %v1911_v8, %v1913_v9 }
 0x1ed   : > { %2608 = vmatpush3.msra.mxu0 %v3008_v5  ;;  %v1316_v54 = vmul.f32 %v2685_v53, %v3040_v14  ;;  %2609 = vmatprep.mubr.msk.f32.mxu0 %vm2753_vm2, %v2752_v6 }
 0x1ef   : > { %2595 = vmatmul.mubr.msk.f32.vlgmr.msra.gmra.mxu1 %vm1170_vm3, %v1316_v54 }
 0x1f0   : > { %2603 = vmatpush3.msra.mxu1 %v3010_v7  ;;  %2604 = vmatprep.mubr.msk.f32.mxu1 %vm2753_vm2, %v2752_v6  ;;  %v1974_v7 = vunpack.c.l.s4 %v2755_v0 }
 0x1f2   : > { %v1975_v10 = vunpack.c.0.s8 %v1974_v7 }
 0x1f3   : > { %v2687_v4 = vpop.eup %2686 }
 0x1f4   : > { %v1322_v55 = vmul.f32 %v2687_v4, %v2673_v28  ;;  %v3084_v19 = vsub.s32 %v1975_v10, %v1913_v9 }
 0x1f5   : > { %v2689_v56 = vpop.eup %2688 }
 0x1f6   : > { %2610 = vmatmul.mubr.msk.f32.vlgmr.msra.gmra.mxu0 %vm1170_vm3, %v1322_v55  ;;  %v1320_v57 = vmul.f32 %v2689_v56, %v2677_v34 }
 0x1f8   : > { %2605 = vmatmul.mubr.msk.f32.vlgmr.msra.gmra.mxu1 %vm1170_vm3, %v1320_v57 }
 0x29a   : > { %v1465_v5 = vpop.f32.mrf.mxu0 }
 0x29c   : > { %v1392_v58 = vpop.f32.mrf.mxu1  ;;  %v2581_v59 = vpop.f32.mrf.mxu0 }
 0x29e   : > { %v2576_v63 = vpop.f32.mrf.mxu1 }
 0x2a2   : > { %v1611_v6 = vpop.f32.mrf.mxu0 }
 0x2a3   : > { %v1923_v12 = vcombine.low %v1465_v5, %v1611_v6  ;;  %v1924_v13 = vcombine.high %v1465_v5, %v1611_v6 }
 0x2a4   : > { %v2591_v15 = vpop.f32.mrf.mxu0 }
 0x2a5   : > { %v1538_v14 = vpop.f32.mrf.mxu1  ;;  %v1931_v21 = vrot.slane %v1923_v12, %v3082_v11  ;;  %v1938_v22 = vrot.slane %v1924_v13, %v3082_v11 }
 0x2a6   : > { %v1907_v17 = vcombine.low %v1392_v58, %v1538_v14  ;;  %v1908_v18 = vcombine.high %v1392_v58, %v1538_v14 }
 0x2a7   : > { %v2586_v20 = vpop.f32.mrf.mxu1 }
 0x2a8   : > { %v1915_v23 = vrot.slane %v1907_v17, %v3082_v11  ;;  %v1922_v25 = vrot.slane %v1908_v18, %v3082_v11 }
 0x2aa   : > { %v1971_v26 = vcombine.low %v1915_v23, %v1931_v21  ;;  %v1972_v27 = vcombine.high %v1915_v23, %v1931_v21  ;;  %v1987_v28 = vcombine.low %v1922_v25, %v1938_v22  ;;  %v1988_v29 = vcombine.high %v1922_v25, %v1938_v22 }
 0x2ac   : > { %v1979_v30 = vrot.slane %v1971_v26, %v3084_v19  ;;  %v1986_v31 = vrot.slane %v1972_v27, %v3084_v19  ;;  %v1995_v32 = vrot.slane %v1987_v28, %v3084_v19  ;;  %v2002_v33 = vrot.slane %v1988_v29, %v3084_v19  ;;  %v1757_v34 = vpop.f32.mrf.mxu0 }
 0x2ae   : > { %v2601_v35 = vpop.f32.mrf.mxu0  ;;  %v2355_v36 = vcombine.low %v1979_v30, %v1986_v31  ;;  %v2357_v37 = vcombine.high %v1979_v30, %v1986_v31  ;;  %v2359_v38 = vcombine.low %v1995_v32, %v2002_v33  ;;  %v2361_v39 = vcombine.high %v1995_v32, %v2002_v33 }
 0x2af   : > { %v1684_v16 = vpop.f32.mrf.mxu1 }
 0x2b0   : > { %v2051_v40 = vrot.slane %v2355_v36, %v3082_v11  ;;  %v2067_v42 = vrot.slane %v2357_v37, %v3082_v11  ;;  %v2083_v24 = vrot.slane %v2359_v38, %v3082_v11  ;;  %v2099_v43 = vrot.slane %v2361_v39, %v3082_v11 }
 0x2b1   : > { %v2596_v1 = vpop.f32.mrf.mxu1 }
 0x2b2   : > { %v2108_v44 = vcombine.high %v2051_v40, %v2067_v42  ;;  %v2140_v45 = vcombine.high %v2083_v24, %v2099_v43  ;;  %v2107_v46 = vcombine.low %v2051_v40, %v2067_v42  ;;  %v2139_v47 = vcombine.low %v2083_v24, %v2099_v43 }
 0x2b4   : > { %v2122_v48 = vrot.slane %v2108_v44, %v3084_v19  ;;  %v2154_v49 = vrot.slane %v2140_v45, %v3084_v19  ;;  %v3101_v2 = vrot.slane %v2107_v46, %v3084_v19  ;;  %v2147_v51 = vrot.slane %v2139_v47, %v3084_v19 }
 0x2b6   : > { %v1903_v52 = vpop.f32.mrf.mxu0  ;;  %v2173_v41 = vcombine.low %v2122_v48, %v2154_v49  ;;  %v2172_v3 = vcombine.high %v3101_v2, %v2147_v51  ;;  %v2171_v50 = vcombine.low %v3101_v2, %v2147_v51 }
 0x2b7   : > { %v1955_v53 = vcombine.low %v1757_v34, %v1903_v52  ;;  %v1956_v54 = vcombine.high %v1757_v34, %v1903_v52  ;;  %v2174_v34 = vcombine.high %v2122_v48, %v2154_v49 }
 0x2b8   : > { %v1830_v4 = vpop.f32.mrf.mxu1  ;;  %v2611_v55 = vpop.f32.mrf.mxu0  ;;  %2184 = vrot.lane.b32.xlu1 %v2173_v41, %s2756_s13  ;;  %2180 = vrot.lane.b32.xlu0 %v2172_v3, %s2757_s14 }
 0x2b9   : > { %v1939_v56 = vcombine.low %v1684_v16, %v1830_v4  ;;  %v1940_v57 = vcombine.high %v1684_v16, %v1830_v4  ;;  %v1963_v58 = vrot.slane %v1955_v53, %v3082_v11  ;;  %v1970_v59 = vrot.slane %v1956_v54, %v3082_v11 }
 0x2ba   : > { %v2606_v5 = vpop.f32.mrf.mxu1 }
 0x2bb   : > { %v1947_v60 = vrot.slane %v1939_v56, %v3082_v11  ;;  %v1954_v61 = vrot.slane %v1940_v57, %v3082_v11 }
 0x2bd   : > { %v2003_v62 = vcombine.low %v1947_v60, %v1963_v58  ;;  %v2004_v63 = vcombine.high %v1947_v60, %v1963_v58  ;;  %v2019_v0 = vcombine.low %v1954_v61, %v1970_v59  ;;  %v2020_v7 = vcombine.high %v1954_v61, %v1970_v59 }
 0x2bf   : > { %v2011_v8 = vrot.slane %v2003_v62, %v3084_v19  ;;  %v2018_v9 = vrot.slane %v2004_v63, %v3084_v19  ;;  %v2027_v6 = vrot.slane %v2019_v0, %v3084_v19  ;;  %v2034_v10 = vrot.slane %v2020_v7, %v3084_v19 }
 0x2c1   : > { %v2356_v12 = vcombine.low %v2011_v8, %v2018_v9  ;;  %v2358_v13 = vcombine.high %v2011_v8, %v2018_v9  ;;  %v2360_v15 = vcombine.low %v2027_v6, %v2034_v10  ;;  %v2362_v14 = vcombine.high %v2027_v6, %v2034_v10 }
 0x2c3   : > { %v2058_v17 = vrot.slane %v2356_v12, %v3082_v11  ;;  %v2074_v18 = vrot.slane %v2358_v13, %v3082_v11  ;;  %v2090_v20 = vrot.slane %v2360_v15, %v3082_v11  ;;  %v2106_v21 = vrot.slane %v2362_v14, %v3082_v11 }
 0x2c5   : > { %v2124_v22 = vcombine.high %v2058_v17, %v2074_v18  ;;  %v2156_v23 = vcombine.high %v2090_v20, %v2106_v21  ;;  %v2123_v25 = vcombine.low %v2058_v17, %v2074_v18  ;;  %v2155_v26 = vcombine.low %v2090_v20, %v2106_v21 }
 0x2c7   : > { %v2138_v27 = vrot.slane %v2124_v22, %v3084_v19  ;;  %v2170_v28 = vrot.slane %v2156_v23, %v3084_v19  ;;  %v2131_v29 = vrot.slane %v2123_v25, %v3084_v19  ;;  %v2163_v30 = vrot.slane %v2155_v26, %v3084_v19 }
 0x2c9   : > { %v2177_v31 = vcombine.low %v2138_v27, %v2170_v28  ;;  %v2176_v32 = vcombine.high %v2131_v29, %v2163_v30  ;;  %v2175_v33 = vcombine.low %v2131_v29, %v2163_v30  ;;  %v2178_v11 = vcombine.high %v2138_v27, %v2170_v28 }
 0x2cb   : > { %2196 = vrot.lane.b32.xlu1 %v2177_v31, %s2756_s13  ;;  %2192 = vrot.lane.b32.xlu0 %v2176_v32, %s2757_s14 }
 0x2cf   : > { %2200 = vrot.lane.b32.xlu1 %v2178_v11, %s2758_s15  ;;  %2188 = vrot.lane.b32.xlu0 %v2174_v34, %s2758_s15 }
 0x32a   : > { %v2185_v35 = vpop.permute.xlu1 %2184  ;;  %v2181_v36 = vpop.permute.xlu0 %2180 }
 0x32b   : > { %v2203_v19 = vsel %vm286_vm0, %v2171_v50, %v2181_v36 }
 0x32c   : > { %v2205_v42 = vsel %vm2204_vm4, %v2203_v19, %v2185_v35 }
 0x33d   : > { %v2197_v37 = vpop.permute.xlu1 %2196  ;;  %v2193_v38 = vpop.permute.xlu0 %2192 }
 0x33e   : > { %v2208_v39 = vsel %vm286_vm0, %v2175_v33, %v2193_v38 }
 0x33f   : > { %v2209_v40 = vsel %vm2204_vm4, %v2208_v39, %v2197_v37 }
 0x341   : > { %v2201_v16 = vpop.permute.xlu1 %2200  ;;  %v2189_v24 = vpop.permute.xlu0 %2188 }
 0x342   : > { %v2210_v43 = vsel %vm2206_vm5, %v2209_v40, %v2201_v16  ;;  %v2207_v1 = vsel %vm2206_vm5, %v2205_v42, %v2189_v24 }
 0x343   : > { %2212 = vst [vmem:[%s252_s25 + $0x8] sm:$0xff] %v2210_v43  ;;  %2211 = vst [vmem:[%s252_s25] sm:$0xff] %v2207_v1 }
 0x344   : > { %2703 = shalt.err (!%p2700_p3)
}
 0x345   : > { %s2704_s12 = scalar_lea.hbm %s3133_s7, 256  ;;  %s2708_s15 = scalar_lea.hbm %s3179_s5, 512 }
 0x346   : > { %p2705_p4 = scmp.ne.s32.totalorder %s3133_s7, %s2704_s12  ;;  %p2709_p9 = scmp.lt.s32.totalorder %s3133_s7, %s3179_s5 }
 0x347   : > { %p2710_p10 = scmp.lt.s32.totalorder %s2708_s15, %s2704_s12 }
 0x348   : > { %p2706_p7 = pnand %p2705_p4, %p2828_p5 }
 0x349   : > { %p2711_p11 = por %p2710_p10, %p2709_p9 }
 0x34a   : > { %p2707_p8 = pneg %p2706_p7 }
 0x34c   : > { %p2712_p12 = pnand %p2711_p11, %p2707_p8 }
 0x34e   : > { %2715 = shalt.err (!%p2712_p12)
}
 0x34f   : > { %2612 = dma.vmem_to_hbm [thread:$0]  (%p2828_p5), %s3135_s26, 256, %s3133_s7, %s2214_s22  }
 0x350 PF: > { %p2618_p13 = scmp.ge.s32.totalorder %s2750_s21, 2  ;;  %s2240_s23 = sand.u32 1, %s2738_s18  }
 0x351   : > { %s2241_s25 = scalar_lea.sflag [#allocation3], %s2240_s23 }
 0x352   : > { %p2615_p0 = pnand %p2618_p13, %p2832_p6 }
 0x354   : > { %p2616_p1 = pneg %p2615_p0 }
 0x356   : > { %2733 = dma.done.wait (%p2616_p1), %s2241_s25, 256  }
 0x357   : > { %2735 = vsyncadd (%p2616_p1), %s2241_s25, 4294967040  ;;  %p15_p2 = scmp.ge.s32.totalorder %s2815_s24, 4   ;;  %s3182_s18 = smov %s2742_s19 }
 0x358   : > { %s3183_s19 = smov %s2746_s20  ;;  %s3184_s20 = smov %s2826_s27 }
 0x359   : > { %s3185_s21 = smov %s2815_s24  ;;  %17 = sbr.rel (!%p15_p2) target bundleno = 3 (0x3), region = 81 }
 0x35e   :  { %2246 = vsyncpa [#allocation3], 1 }
 0x35f   :  { %2248 = vsyncpa [#allocation3 + $0x1], 1 }

</bundles_post_ra>
